<compile_context>
chip_gen: v7x
topology: tpu7x:2x2x1
jax: 0.10.0
libtpu: 0.0.40
codegen_flags: <defaults>
</compile_context>

<pallas_src>
import functools
import math

import jax
import jax.numpy as jnp
from jax import lax
from jax.experimental import pallas as pl
from jax.experimental.pallas import tpu as pltpu


def make_divisible(x, divisor):
    return math.ceil(x / divisor) * divisor


def _silu(v):
    # Exact SiLU; same formula in kernel and reference so numerics stay tight.
    # (pl.reciprocal(..., approx=True) would shave VALU work but its ~2^-12
    #  rel-err is borderline vs. the allclose tolerance -- kept exact.)
    return v * (1.0 / (1.0 + jnp.exp(-v)))


# ----------------------------- Pallas kernel -------------------------------

def _sppf_kernel(x_ref, w1_ref, b1_ref, w2_ref, b2_ref, o_ref, *, W, radius):
    """One batch group.  x_ref: (nb*c1, HW); o_ref: (nb*c2, HW).

    The nb images of the group are stacked on the sublane axis; the 1x1 convs
    use block-diagonal BN-folded weights so a single MXU matmul covers the
    whole group, and the pool cascade runs on full (8,128) vregs.
    """
    HW = x_ref.shape[1]
    rows = w1_ref.shape[0]            # nb * c_  (sublane rows through the pools)
    neg = jnp.float32(-jnp.inf)

    # Image-row id per lane from an in-kernel iota (no rowid input needed).
    # Row ids are small integers -> exact in f32 (division + floor is exact
    # for these magnitudes).
    lane = lax.broadcasted_iota(jnp.int32, (1, HW), 1).astype(jnp.float32)
    rowid = jnp.floor(lane / float(W))

    # Shift tables + additive -inf edge masks for the separable (2r+1)^2 max
    # pool.  Built ONCE per kernel invocation (the whole batch group is one
    # grid step) and reused by all three cascaded pools.  Masks are derived by
    # rolling the row-id map with the SAME pltpu.roll as the data, so they are
    # roll-direction agnostic; each mask is pre-broadcast to the full pool
    # shape so the per-tap adds do not re-broadcast a (1, HW) vreg.
    h_taps = []   # W-direction neighbours +/-d : (shift, additive mask)
    v_taps = []   # H-direction neighbours +/-d : (shift, additive mask)
    for d in range(1, radius + 1):
        for s in (d, HW - d):
            ok = pltpu.roll(rowid, s, axis=1) == rowid
            h_taps.append(
                (s, jnp.broadcast_to(jnp.where(ok, 0.0, neg), (rows, HW))))
        for s in (d * W, HW - d * W):
            ok = jnp.abs(pltpu.roll(rowid, s, axis=1) - rowid) == float(d)
            v_taps.append(
                (s, jnp.broadcast_to(jnp.where(ok, 0.0, neg), (rows, HW))))

    def pool(t):
        # Separable max pool, stride 1, -inf padding: k-wide then k-tall.
        r = t
        for s, m in h_taps:
            r = jnp.maximum(r, pltpu.roll(t, s, axis=1) + m)
        o = r
        for s, m in v_taps:
            o = jnp.maximum(o, pltpu.roll(r, s, axis=1) + m)
        return o

    x = x_ref[...]                                                # (nb*c1, HW)

    # cv1 (+ folded BN) for the whole group in one MXU matmul.
    a = _silu(jnp.dot(w1_ref[...], x, preferred_element_type=jnp.float32)
              + b1_ref[...])                                      # (nb*c_, HW)

    y1 = pool(a)
    y2 = pool(y1)
    y3 = pool(y2)

    # cv2 (+ folded BN): the channel concat of [a, y1, y2, y3] is folded into
    # the sum of four MXU matmuls (no in-kernel concatenate / relayout).
    acc = jnp.dot(w2_ref[0], a, preferred_element_type=jnp.float32)
    acc = acc + jnp.dot(w2_ref[1], y1, preferred_element_type=jnp.float32)
    acc = acc + jnp.dot(w2_ref[2], y2, preferred_element_type=jnp.float32)
    acc = acc + jnp.dot(w2_ref[3], y3, preferred_element_type=jnp.float32)
    o_ref[...] = _silu(acc + b2_ref[...]).astype(o_ref.dtype)


def _sppf_pallas(x2d, w1bd, b1t, w2p, b2t, *, W, radius, nb, c1, c2):
    NC1, HW = x2d.shape
    N = NC1 // c1
    G = N // nb                      # grid steps (batch groups)
    rows_in = nb * c1
    rows_out = nb * c2

    kernel = functools.partial(_sppf_kernel, W=W, radius=radius)
    return pl.pallas_call(
        kernel,
        out_shape=jax.ShapeDtypeStruct((N * c2, HW), jnp.float32),
        grid_spec=pltpu.PrefetchScalarGridSpec(
            num_scalar_prefetch=0,
            grid=(G,),
            in_specs=[
                pl.BlockSpec((rows_in, HW), lambda g: (g, 0)),
                pl.BlockSpec(w1bd.shape, lambda g: (0, 0)),
                pl.BlockSpec(b1t.shape, lambda g: (0, 0)),
                pl.BlockSpec(w2p.shape, lambda g: (0, 0, 0)),
                pl.BlockSpec(b2t.shape, lambda g: (0, 0)),
            ],
            out_specs=pl.BlockSpec((rows_out, HW), lambda g: (g, 0)),
        ),
        # "parallel" lets v7x's two TensorCores split batch groups when G > 1;
        # on single-TC v5e/v6e the default grouping gives G == 1 anyway.
        compiler_params=pltpu.CompilerParams(
            dimension_semantics=("parallel",)),
        # NOTE: at production SPPF widths, re-budget the block against v7x's
        # 64 MiB VMEM and set vmem_limit_bytes explicitly; at this size the
        # footprint is tens of KiB so the default scoped limit is fine.
    )(x2d, w1bd, b1t, w2p, b2t)


# ----------------------------- forward wrapper ------------------------------

def sppf_forward(x_nchw, params, k=5, eps=1e-5, images_per_block=None):
    """SPPF forward (NCHW in / NCHW out, inference BatchNorm semantics)."""
    N, c1, H, W = x_nchw.shape
    HW = H * W
    c_ = params["w1"].shape[0]
    c2 = params["w2"].shape[0]
    radius = k // 2
    assert k % 2 == 1, "SPPF uses an odd pooling kernel"
    assert H >= 2 * radius + 1, "edge-mask trick needs H >= k"

    # Images per grid step: fill the 8 sublanes of the pool vregs and fold the
    # (small) batch into as few grid steps as possible.  On v7x pass
    # images_per_block=ceil(N/2) so the two TensorCores split the batch.
    if images_per_block is None:
        images_per_block = max(1, min(N, -(-8 // max(c_, 1))))
    nb = max(1, min(N, images_per_block))
    while N % nb:
        nb -= 1

    def fold_bn(bn):
        gamma, beta, mean, var = bn
        scale = gamma / jnp.sqrt(var + eps)
        return scale, beta - mean * scale

    s1, b1 = fold_bn(params["bn1"])
    s2, b2 = fold_bn(params["bn2"])

    # Fold BN scale into the conv weights and expand to block-diagonal form so
    # one matmul covers all nb sublane-stacked images (nb == 1 degenerates to
    # the plain weights).  cv2's weight is pre-split into its 4 concat
    # branches: (4, nb*c2, nb*c_).
    eye = jnp.eye(nb, dtype=jnp.float32)
    w1f = params["w1"].astype(jnp.float32) * s1[:, None]              # (c_, c1)
    w2f = params["w2"].astype(jnp.float32) * s2[:, None]              # (c2, 4c_)
    w1bd = jnp.kron(eye, w1f)                                         # (nb*c_, nb*c1)
    w2p = jnp.stack([jnp.kron(eye, w2f[:, p * c_:(p + 1) * c_])
                     for p in range(4)])                              # (4, nb*c2, nb*c_)
    b1t = jnp.tile(b1, nb).reshape(nb * c_, 1)
    b2t = jnp.tile(b2, nb).reshape(nb * c2, 1)

    x2d = x_nchw.astype(jnp.float32).reshape(N * c1, HW)              # pure reshape

    out = _sppf_pallas(x2d, w1bd, b1t, w2p, b2t,
                       W=W, radius=radius, nb=nb, c1=c1, c2=c2)
    return out.reshape(N, c2, H, W)


# ----------------------------- parameters ----------------------------------

def make_params(key, c1, c2_arg, e=0.5, ratio=1.0):
    c_ = int(c1 * e)
    c2 = make_divisible(int(c2_arg * ratio), 8)
    ks = jax.random.split(key, 4)
    w1 = jax.random.normal(ks[0], (c_, c1), jnp.float32) / math.sqrt(c1)
    w2 = jax.random.normal(ks[1], (c2, 4 * c_), jnp.float32) / math.sqrt(4 * c_)

    def bn_params(kk, c):
        k1, k2, k3, k4 = jax.random.split(kk, 4)
        gamma = jax.random.uniform(k1, (c,), jnp.float32, 0.5, 1.5)
        beta = jax.random.normal(k2, (c,), jnp.float32) * 0.1
        mean = jax.random.normal(k3, (c,), jnp.float32) * 0.1
        var = jax.random.uniform(k4, (c,), jnp.float32, 0.5, 1.5)
        return gamma, beta, mean, var

    return dict(w1=w1, bn1=bn_params(ks[2], c_),
                w2=w2, bn2=bn_params(ks[3], c2),
                c_=c_, c2=c2)


# ----------------------------- pure-JAX reference ---------------------------

def _ref_sppf(x, params, k=5, eps=1e-5):
    def conv_bn_silu(t, w, bn):
        gamma, beta, mean, var = bn
        y = lax.conv_general_dilated(t, w[:, :, None, None], (1, 1), "VALID",
                                     dimension_numbers=("NCHW", "OIHW", "NCHW"))
        scale = gamma / jnp.sqrt(var + eps)
        bias = beta - mean * scale
        y = y * scale[None, :, None, None] + bias[None, :, None, None]
        return _silu(y)

    def mp(t):
        p = k // 2
        return lax.reduce_window(t, -jnp.inf, lax.max,
                                 (1, 1, k, k), (1, 1, 1, 1),
                                 ((0, 0), (0, 0), (p, p), (p, p)))

    a = conv_bn_silu(x, params["w1"], params["bn1"])
    y1 = mp(a)
    y2 = mp(y1)
    y3 = mp(y2)
    cat = jnp.concatenate([a, y1, y2, y3], axis=1)
    return conv_bn_silu(cat, params["w2"], params["bn2"])


# ----------------------------- main -----------------------------------------

if __name__ == "__main__":
    key = jax.random.PRNGKey(0)
    kx, kp = jax.random.split(key)

    # SPPF(c1=8, c2=8, k=5, e=0.5, ratio=1.0) -> c_ = 4, cat = 16 ch, out = 8 ch
    N, c1, H, W = 2, 8, 16, 16
    c2_arg = 8

    params = make_params(kp, c1, c2_arg)
    x = jax.random.normal(kx, (N, c1, H, W), jnp.float32)

    out = jax.block_until_ready(sppf_forward(x, params))
    ref = jax.block_until_ready(_ref_sppf(x, params))

    assert out.shape == ref.shape == (N, params["c2"], H, W), (out.shape, ref.shape)
    # Tolerance leaves headroom for MXU f32 rounding and BN-folding
    # associativity vs. the straight XLA conv+BN reference.
    err = float(jnp.max(jnp.abs(out - ref)))
    assert jnp.allclose(out, ref, atol=1e-3, rtol=1e-3), err
    print("KERNEL_OK")
</pallas_src>

<mosaic_0001>
module attributes {stable_mosaic.version = 11 : i64} {
  func.func @_sppf_kernel(%arg0: i32, %arg1: memref<16x256xf32, #tpu.memory_space<vmem>>, %arg2: memref<8x16xf32, #tpu.memory_space<vmem>>, %arg3: memref<8x1xf32, #tpu.memory_space<vmem>>, %arg4: memref<4x16x8xf32, #tpu.memory_space<vmem>>, %arg5: memref<16x1xf32, #tpu.memory_space<vmem>>, %arg6: memref<16x256xf32, #tpu.memory_space<vmem>>) attributes {dimension_semantics = [#tpu.dimension_semantics<parallel>], iteration_bounds = array<i64: 1>, scalar_prefetch = 0 : i64, scratch_operands = 0 : i64, tpu.core_type = #tpu.core_type<tc>, window_params = [{transform_indices = @transform_0, window_bounds = array<i64: 16, 256>}, {pipeline_mode = #tpu.pipeline_mode<synchronous>, transform_indices = @transform_1, window_bounds = array<i64: 8, 16>}, {pipeline_mode = #tpu.pipeline_mode<synchronous>, transform_indices = @transform_2, window_bounds = array<i64: 8, 1>}, {pipeline_mode = #tpu.pipeline_mode<synchronous>, transform_indices = @transform_3, window_bounds = array<i64: 4, 16, 8>}, {pipeline_mode = #tpu.pipeline_mode<synchronous>, transform_indices = @transform_4, window_bounds = array<i64: 16, 1>}, {transform_indices = @transform_5, window_bounds = array<i64: 16, 256>}]} {
    %0 = tpu.iota {dimensions = array<i32: 1>} : vector<1x256xi32>
    %1 = arith.sitofp %0 : vector<1x256xi32> to vector<1x256xf32>
    %cst = arith.constant 1.600000e+01 : f32
    %2 = vector.broadcast %cst : f32 to vector<1x256xf32>
    %3 = arith.divf %1, %2 : vector<1x256xf32>
    %4 = math.floor %3 : vector<1x256xf32>
    %c1_i32 = arith.constant 1 : i32
    %5 = tpu.dynamic_rotate %4 by %c1_i32 dim 1 : vector<1x256xf32>, i32 -> vector<1x256xf32>
    %6 = arith.cmpf oeq, %5, %4 : vector<1x256xf32>
    %cst_0 = arith.constant 0.000000e+00 : f32
    %cst_1 = arith.constant 0xFF800000 : f32
    %7 = vector.broadcast %cst_0 : f32 to vector<1x256xf32>
    %8 = vector.broadcast %cst_1 : f32 to vector<1x256xf32>
    %9 = arith.select %6, %7, %8 : vector<1x256xi1>, vector<1x256xf32>
    %10 = vector.shape_cast %9 : vector<1x256xf32> to vector<1x256xf32>
    %11 = vector.broadcast %10 : vector<1x256xf32> to vector<8x256xf32>
    %c255_i32 = arith.constant 255 : i32
    %12 = tpu.dynamic_rotate %4 by %c255_i32 dim 1 : vector<1x256xf32>, i32 -> vector<1x256xf32>
    %13 = arith.cmpf oeq, %12, %4 : vector<1x256xf32>
    %cst_2 = arith.constant 0.000000e+00 : f32
    %cst_3 = arith.constant 0xFF800000 : f32
    %14 = vector.broadcast %cst_2 : f32 to vector<1x256xf32>
    %15 = vector.broadcast %cst_3 : f32 to vector<1x256xf32>
    %16 = arith.select %13, %14, %15 : vector<1x256xi1>, vector<1x256xf32>
    %17 = vector.shape_cast %16 : vector<1x256xf32> to vector<1x256xf32>
    %18 = vector.broadcast %17 : vector<1x256xf32> to vector<8x256xf32>
    %c16_i32 = arith.constant 16 : i32
    %19 = tpu.dynamic_rotate %4 by %c16_i32 dim 1 : vector<1x256xf32>, i32 -> vector<1x256xf32>
    %20 = arith.subf %19, %4 : vector<1x256xf32>
    %21 = math.absf %20 : vector<1x256xf32>
    %cst_4 = arith.constant 1.000000e+00 : f32
    %22 = vector.broadcast %cst_4 : f32 to vector<1x256xf32>
    %23 = arith.cmpf oeq, %21, %22 : vector<1x256xf32>
    %cst_5 = arith.constant 0.000000e+00 : f32
    %cst_6 = arith.constant 0xFF800000 : f32
    %24 = vector.broadcast %cst_5 : f32 to vector<1x256xf32>
    %25 = vector.broadcast %cst_6 : f32 to vector<1x256xf32>
    %26 = arith.select %23, %24, %25 : vector<1x256xi1>, vector<1x256xf32>
    %27 = vector.shape_cast %26 : vector<1x256xf32> to vector<1x256xf32>
    %28 = vector.broadcast %27 : vector<1x256xf32> to vector<8x256xf32>
    %c240_i32 = arith.constant 240 : i32
    %29 = tpu.dynamic_rotate %4 by %c240_i32 dim 1 : vector<1x256xf32>, i32 -> vector<1x256xf32>
    %30 = arith.subf %29, %4 : vector<1x256xf32>
    %31 = math.absf %30 : vector<1x256xf32>
    %cst_7 = arith.constant 1.000000e+00 : f32
    %32 = vector.broadcast %cst_7 : f32 to vector<1x256xf32>
    %33 = arith.cmpf oeq, %31, %32 : vector<1x256xf32>
    %cst_8 = arith.constant 0.000000e+00 : f32
    %cst_9 = arith.constant 0xFF800000 : f32
    %34 = vector.broadcast %cst_8 : f32 to vector<1x256xf32>
    %35 = vector.broadcast %cst_9 : f32 to vector<1x256xf32>
    %36 = arith.select %33, %34, %35 : vector<1x256xi1>, vector<1x256xf32>
    %37 = vector.shape_cast %36 : vector<1x256xf32> to vector<1x256xf32>
    %38 = vector.broadcast %37 : vector<1x256xf32> to vector<8x256xf32>
    %c2_i32 = arith.constant 2 : i32
    %39 = tpu.dynamic_rotate %4 by %c2_i32 dim 1 : vector<1x256xf32>, i32 -> vector<1x256xf32>
    %40 = arith.cmpf oeq, %39, %4 : vector<1x256xf32>
    %cst_10 = arith.constant 0.000000e+00 : f32
    %cst_11 = arith.constant 0xFF800000 : f32
    %41 = vector.broadcast %cst_10 : f32 to vector<1x256xf32>
    %42 = vector.broadcast %cst_11 : f32 to vector<1x256xf32>
    %43 = arith.select %40, %41, %42 : vector<1x256xi1>, vector<1x256xf32>
    %44 = vector.shape_cast %43 : vector<1x256xf32> to vector<1x256xf32>
    %45 = vector.broadcast %44 : vector<1x256xf32> to vector<8x256xf32>
    %c254_i32 = arith.constant 254 : i32
    %46 = tpu.dynamic_rotate %4 by %c254_i32 dim 1 : vector<1x256xf32>, i32 -> vector<1x256xf32>
    %47 = arith.cmpf oeq, %46, %4 : vector<1x256xf32>
    %cst_12 = arith.constant 0.000000e+00 : f32
    %cst_13 = arith.constant 0xFF800000 : f32
    %48 = vector.broadcast %cst_12 : f32 to vector<1x256xf32>
    %49 = vector.broadcast %cst_13 : f32 to vector<1x256xf32>
    %50 = arith.select %47, %48, %49 : vector<1x256xi1>, vector<1x256xf32>
    %51 = vector.shape_cast %50 : vector<1x256xf32> to vector<1x256xf32>
    %52 = vector.broadcast %51 : vector<1x256xf32> to vector<8x256xf32>
    %c32_i32 = arith.constant 32 : i32
    %53 = tpu.dynamic_rotate %4 by %c32_i32 dim 1 : vector<1x256xf32>, i32 -> vector<1x256xf32>
    %54 = arith.subf %53, %4 : vector<1x256xf32>
    %55 = math.absf %54 : vector<1x256xf32>
    %cst_14 = arith.constant 2.000000e+00 : f32
    %56 = vector.broadcast %cst_14 : f32 to vector<1x256xf32>
    %57 = arith.cmpf oeq, %55, %56 : vector<1x256xf32>
    %cst_15 = arith.constant 0.000000e+00 : f32
    %cst_16 = arith.constant 0xFF800000 : f32
    %58 = vector.broadcast %cst_15 : f32 to vector<1x256xf32>
    %59 = vector.broadcast %cst_16 : f32 to vector<1x256xf32>
    %60 = arith.select %57, %58, %59 : vector<1x256xi1>, vector<1x256xf32>
    %61 = vector.shape_cast %60 : vector<1x256xf32> to vector<1x256xf32>
    %62 = vector.broadcast %61 : vector<1x256xf32> to vector<8x256xf32>
    %c224_i32 = arith.constant 224 : i32
    %63 = tpu.dynamic_rotate %4 by %c224_i32 dim 1 : vector<1x256xf32>, i32 -> vector<1x256xf32>
    %64 = arith.subf %63, %4 : vector<1x256xf32>
    %65 = math.absf %64 : vector<1x256xf32>
    %cst_17 = arith.constant 2.000000e+00 : f32
    %66 = vector.broadcast %cst_17 : f32 to vector<1x256xf32>
    %67 = arith.cmpf oeq, %65, %66 : vector<1x256xf32>
    %cst_18 = arith.constant 0.000000e+00 : f32
    %cst_19 = arith.constant 0xFF800000 : f32
    %68 = vector.broadcast %cst_18 : f32 to vector<1x256xf32>
    %69 = vector.broadcast %cst_19 : f32 to vector<1x256xf32>
    %70 = arith.select %67, %68, %69 : vector<1x256xi1>, vector<1x256xf32>
    %71 = vector.shape_cast %70 : vector<1x256xf32> to vector<1x256xf32>
    %72 = vector.broadcast %71 : vector<1x256xf32> to vector<8x256xf32>
    %c0 = arith.constant 0 : index
    %c0_20 = arith.constant 0 : index
    %73 = vector.load %arg1[%c0, %c0_20] : memref<16x256xf32, #tpu.memory_space<vmem>>, vector<16x256xf32>
    %c0_21 = arith.constant 0 : index
    %c0_22 = arith.constant 0 : index
    %74 = vector.load %arg2[%c0_21, %c0_22] : memref<8x16xf32, #tpu.memory_space<vmem>>, vector<8x16xf32>
    %cst_23 = arith.constant dense<0.000000e+00> : vector<8x256xf32>
    %75 = tpu.matmul %74, %73, %cst_23 {dimension_numbers = #tpu.dot_dimension_numbers<[1], [0], [0], [1], [0, 0, 1, 1], [], []>} : vector<8x16xf32>, vector<16x256xf32>, vector<8x256xf32> -> vector<8x256xf32>
    %c0_24 = arith.constant 0 : index
    %c0_25 = arith.constant 0 : index
    %76 = vector.load %arg3[%c0_24, %c0_25] : memref<8x1xf32, #tpu.memory_space<vmem>>, vector<8x1xf32>
    %77 = vector.broadcast %76 : vector<8x1xf32> to vector<8x256xf32>
    %78 = arith.addf %75, %77 : vector<8x256xf32>
    %cst_26 = arith.constant 0.000000e+00 : f32
    %79 = vector.broadcast %cst_26 : f32 to vector<8x256xf32>
    %80 = arith.subf %79, %78 : vector<8x256xf32>
    %81 = math.exp %80 : vector<8x256xf32>
    %cst_27 = arith.constant 1.000000e+00 : f32
    %82 = vector.broadcast %cst_27 : f32 to vector<8x256xf32>
    %83 = arith.addf %82, %81 : vector<8x256xf32>
    %cst_28 = arith.constant 1.000000e+00 : f32
    %84 = vector.broadcast %cst_28 : f32 to vector<8x256xf32>
    %85 = arith.divf %84, %83 : vector<8x256xf32>
    %86 = arith.mulf %78, %85 : vector<8x256xf32>
    %c1_i32_29 = arith.constant 1 : i32
    %87 = tpu.dynamic_rotate %86 by %c1_i32_29 dim 1 : vector<8x256xf32>, i32 -> vector<8x256xf32>
    %88 = arith.addf %87, %11 : vector<8x256xf32>
    %89 = arith.maximumf %86, %88 : vector<8x256xf32>
    %c255_i32_30 = arith.constant 255 : i32
    %90 = tpu.dynamic_rotate %86 by %c255_i32_30 dim 1 : vector<8x256xf32>, i32 -> vector<8x256xf32>
    %91 = arith.addf %90, %18 : vector<8x256xf32>
    %92 = arith.maximumf %89, %91 : vector<8x256xf32>
    %c2_i32_31 = arith.constant 2 : i32
    %93 = tpu.dynamic_rotate %86 by %c2_i32_31 dim 1 : vector<8x256xf32>, i32 -> vector<8x256xf32>
    %94 = arith.addf %93, %45 : vector<8x256xf32>
    %95 = arith.maximumf %92, %94 : vector<8x256xf32>
    %c254_i32_32 = arith.constant 254 : i32
    %96 = tpu.dynamic_rotate %86 by %c254_i32_32 dim 1 : vector<8x256xf32>, i32 -> vector<8x256xf32>
    %97 = arith.addf %96, %52 : vector<8x256xf32>
    %98 = arith.maximumf %95, %97 : vector<8x256xf32>
    %c16_i32_33 = arith.constant 16 : i32
    %99 = tpu.dynamic_rotate %98 by %c16_i32_33 dim 1 : vector<8x256xf32>, i32 -> vector<8x256xf32>
    %100 = arith.addf %99, %28 : vector<8x256xf32>
    %101 = arith.maximumf %98, %100 : vector<8x256xf32>
    %c240_i32_34 = arith.constant 240 : i32
    %102 = tpu.dynamic_rotate %98 by %c240_i32_34 dim 1 : vector<8x256xf32>, i32 -> vector<8x256xf32>
    %103 = arith.addf %102, %38 : vector<8x256xf32>
    %104 = arith.maximumf %101, %103 : vector<8x256xf32>
    %c32_i32_35 = arith.constant 32 : i32
    %105 = tpu.dynamic_rotate %98 by %c32_i32_35 dim 1 : vector<8x256xf32>, i32 -> vector<8x256xf32>
    %106 = arith.addf %105, %62 : vector<8x256xf32>
    %107 = arith.maximumf %104, %106 : vector<8x256xf32>
    %c224_i32_36 = arith.constant 224 : i32
    %108 = tpu.dynamic_rotate %98 by %c224_i32_36 dim 1 : vector<8x256xf32>, i32 -> vector<8x256xf32>
    %109 = arith.addf %108, %72 : vector<8x256xf32>
    %110 = arith.maximumf %107, %109 : vector<8x256xf32>
    %c1_i32_37 = arith.constant 1 : i32
    %111 = tpu.dynamic_rotate %110 by %c1_i32_37 dim 1 : vector<8x256xf32>, i32 -> vector<8x256xf32>
    %112 = arith.addf %111, %11 : vector<8x256xf32>
    %113 = arith.maximumf %110, %112 : vector<8x256xf32>
    %c255_i32_38 = arith.constant 255 : i32
    %114 = tpu.dynamic_rotate %110 by %c255_i32_38 dim 1 : vector<8x256xf32>, i32 -> vector<8x256xf32>
    %115 = arith.addf %114, %18 : vector<8x256xf32>
    %116 = arith.maximumf %113, %115 : vector<8x256xf32>
    %c2_i32_39 = arith.constant 2 : i32
    %117 = tpu.dynamic_rotate %110 by %c2_i32_39 dim 1 : vector<8x256xf32>, i32 -> vector<8x256xf32>
    %118 = arith.addf %117, %45 : vector<8x256xf32>
    %119 = arith.maximumf %116, %118 : vector<8x256xf32>
    %c254_i32_40 = arith.constant 254 : i32
    %120 = tpu.dynamic_rotate %110 by %c254_i32_40 dim 1 : vector<8x256xf32>, i32 -> vector<8x256xf32>
    %121 = arith.addf %120, %52 : vector<8x256xf32>
    %122 = arith.maximumf %119, %121 : vector<8x256xf32>
    %c16_i32_41 = arith.constant 16 : i32
    %123 = tpu.dynamic_rotate %122 by %c16_i32_41 dim 1 : vector<8x256xf32>, i32 -> vector<8x256xf32>
    %124 = arith.addf %123, %28 : vector<8x256xf32>
    %125 = arith.maximumf %122, %124 : vector<8x256xf32>
    %c240_i32_42 = arith.constant 240 : i32
    %126 = tpu.dynamic_rotate %122 by %c240_i32_42 dim 1 : vector<8x256xf32>, i32 -> vector<8x256xf32>
    %127 = arith.addf %126, %38 : vector<8x256xf32>
    %128 = arith.maximumf %125, %127 : vector<8x256xf32>
    %c32_i32_43 = arith.constant 32 : i32
    %129 = tpu.dynamic_rotate %122 by %c32_i32_43 dim 1 : vector<8x256xf32>, i32 -> vector<8x256xf32>
    %130 = arith.addf %129, %62 : vector<8x256xf32>
    %131 = arith.maximumf %128, %130 : vector<8x256xf32>
    %c224_i32_44 = arith.constant 224 : i32
    %132 = tpu.dynamic_rotate %122 by %c224_i32_44 dim 1 : vector<8x256xf32>, i32 -> vector<8x256xf32>
    %133 = arith.addf %132, %72 : vector<8x256xf32>
    %134 = arith.maximumf %131, %133 : vector<8x256xf32>
    %c1_i32_45 = arith.constant 1 : i32
    %135 = tpu.dynamic_rotate %134 by %c1_i32_45 dim 1 : vector<8x256xf32>, i32 -> vector<8x256xf32>
    %136 = arith.addf %135, %11 : vector<8x256xf32>
    %137 = arith.maximumf %134, %136 : vector<8x256xf32>
    %c255_i32_46 = arith.constant 255 : i32
    %138 = tpu.dynamic_rotate %134 by %c255_i32_46 dim 1 : vector<8x256xf32>, i32 -> vector<8x256xf32>
    %139 = arith.addf %138, %18 : vector<8x256xf32>
    %140 = arith.maximumf %137, %139 : vector<8x256xf32>
    %c2_i32_47 = arith.constant 2 : i32
    %141 = tpu.dynamic_rotate %134 by %c2_i32_47 dim 1 : vector<8x256xf32>, i32 -> vector<8x256xf32>
    %142 = arith.addf %141, %45 : vector<8x256xf32>
    %143 = arith.maximumf %140, %142 : vector<8x256xf32>
    %c254_i32_48 = arith.constant 254 : i32
    %144 = tpu.dynamic_rotate %134 by %c254_i32_48 dim 1 : vector<8x256xf32>, i32 -> vector<8x256xf32>
    %145 = arith.addf %144, %52 : vector<8x256xf32>
    %146 = arith.maximumf %143, %145 : vector<8x256xf32>
    %c16_i32_49 = arith.constant 16 : i32
    %147 = tpu.dynamic_rotate %146 by %c16_i32_49 dim 1 : vector<8x256xf32>, i32 -> vector<8x256xf32>
    %148 = arith.addf %147, %28 : vector<8x256xf32>
    %149 = arith.maximumf %146, %148 : vector<8x256xf32>
    %c240_i32_50 = arith.constant 240 : i32
    %150 = tpu.dynamic_rotate %146 by %c240_i32_50 dim 1 : vector<8x256xf32>, i32 -> vector<8x256xf32>
    %151 = arith.addf %150, %38 : vector<8x256xf32>
    %152 = arith.maximumf %149, %151 : vector<8x256xf32>
    %c32_i32_51 = arith.constant 32 : i32
    %153 = tpu.dynamic_rotate %146 by %c32_i32_51 dim 1 : vector<8x256xf32>, i32 -> vector<8x256xf32>
    %154 = arith.addf %153, %62 : vector<8x256xf32>
    %155 = arith.maximumf %152, %154 : vector<8x256xf32>
    %c224_i32_52 = arith.constant 224 : i32
    %156 = tpu.dynamic_rotate %146 by %c224_i32_52 dim 1 : vector<8x256xf32>, i32 -> vector<8x256xf32>
    %157 = arith.addf %156, %72 : vector<8x256xf32>
    %158 = arith.maximumf %155, %157 : vector<8x256xf32>
    %c0_53 = arith.constant 0 : index
    %c0_54 = arith.constant 0 : index
    %c0_55 = arith.constant 0 : index
    %159 = vector.load %arg4[%c0_53, %c0_54, %c0_55] : memref<4x16x8xf32, #tpu.memory_space<vmem>>, vector<1x16x8xf32>
    %160 = vector.shape_cast %159 : vector<1x16x8xf32> to vector<16x8xf32>
    %cst_56 = arith.constant dense<0.000000e+00> : vector<16x256xf32>
    %161 = tpu.matmul %160, %86, %cst_56 {dimension_numbers = #tpu.dot_dimension_numbers<[1], [0], [0], [1], [0, 0, 1, 1], [], []>} : vector<16x8xf32>, vector<8x256xf32>, vector<16x256xf32> -> vector<16x256xf32>
    %c1 = arith.constant 1 : index
    %c0_57 = arith.constant 0 : index
    %c0_58 = arith.constant 0 : index
    %162 = vector.load %arg4[%c1, %c0_57, %c0_58] : memref<4x16x8xf32, #tpu.memory_space<vmem>>, vector<1x16x8xf32>
    %163 = vector.shape_cast %162 : vector<1x16x8xf32> to vector<16x8xf32>
    %cst_59 = arith.constant dense<0.000000e+00> : vector<16x256xf32>
    %164 = tpu.matmul %163, %110, %cst_59 {dimension_numbers = #tpu.dot_dimension_numbers<[1], [0], [0], [1], [0, 0, 1, 1], [], []>} : vector<16x8xf32>, vector<8x256xf32>, vector<16x256xf32> -> vector<16x256xf32>
    %165 = arith.addf %161, %164 : vector<16x256xf32>
    %c2 = arith.constant 2 : index
    %c0_60 = arith.constant 0 : index
    %c0_61 = arith.constant 0 : index
    %166 = vector.load %arg4[%c2, %c0_60, %c0_61] : memref<4x16x8xf32, #tpu.memory_space<vmem>>, vector<1x16x8xf32>
    %167 = vector.shape_cast %166 : vector<1x16x8xf32> to vector<16x8xf32>
    %cst_62 = arith.constant dense<0.000000e+00> : vector<16x256xf32>
    %168 = tpu.matmul %167, %134, %cst_62 {dimension_numbers = #tpu.dot_dimension_numbers<[1], [0], [0], [1], [0, 0, 1, 1], [], []>} : vector<16x8xf32>, vector<8x256xf32>, vector<16x256xf32> -> vector<16x256xf32>
    %169 = arith.addf %165, %168 : vector<16x256xf32>
    %c3 = arith.constant 3 : index
    %c0_63 = arith.constant 0 : index
    %c0_64 = arith.constant 0 : index
    %170 = vector.load %arg4[%c3, %c0_63, %c0_64] : memref<4x16x8xf32, #tpu.memory_space<vmem>>, vector<1x16x8xf32>
    %171 = vector.shape_cast %170 : vector<1x16x8xf32> to vector<16x8xf32>
    %cst_65 = arith.constant dense<0.000000e+00> : vector<16x256xf32>
    %172 = tpu.matmul %171, %158, %cst_65 {dimension_numbers = #tpu.dot_dimension_numbers<[1], [0], [0], [1], [0, 0, 1, 1], [], []>} : vector<16x8xf32>, vector<8x256xf32>, vector<16x256xf32> -> vector<16x256xf32>
    %173 = arith.addf %169, %172 : vector<16x256xf32>
    %c0_66 = arith.constant 0 : index
    %c0_67 = arith.constant 0 : index
    %174 = vector.load %arg5[%c0_66, %c0_67] : memref<16x1xf32, #tpu.memory_space<vmem>>, vector<16x1xf32>
    %175 = vector.broadcast %174 : vector<16x1xf32> to vector<16x256xf32>
    %176 = arith.addf %173, %175 : vector<16x256xf32>
    %cst_68 = arith.constant 0.000000e+00 : f32
    %177 = vector.broadcast %cst_68 : f32 to vector<16x256xf32>
    %178 = arith.subf %177, %176 : vector<16x256xf32>
    %179 = math.exp %178 : vector<16x256xf32>
    %cst_69 = arith.constant 1.000000e+00 : f32
    %180 = vector.broadcast %cst_69 : f32 to vector<16x256xf32>
    %181 = arith.addf %180, %179 : vector<16x256xf32>
    %cst_70 = arith.constant 1.000000e+00 : f32
    %182 = vector.broadcast %cst_70 : f32 to vector<16x256xf32>
    %183 = arith.divf %182, %181 : vector<16x256xf32>
    %184 = arith.mulf %176, %183 : vector<16x256xf32>
    %c0_71 = arith.constant 0 : index
    %c0_72 = arith.constant 0 : index
    %185 = vector.load %arg6[%c0_71, %c0_72] : memref<16x256xf32, #tpu.memory_space<vmem>>, vector<16x256xf32>
    tpu.vector_store %arg6[%c0_71, %c0_72], %184 {strides = array<i32>} : memref<16x256xf32, #tpu.memory_space<vmem>>, vector<16x256xf32>,
    return
  }
  func.func @transform_0(%arg0: i32) -> (i32, i32) {
    %c0_i32 = arith.constant 0 : i32
    %c0_i32_0 = arith.constant 0 : i32
    return %arg0, %c0_i32 : i32, i32
  }
  func.func @transform_1(%arg0: i32) -> (i32, i32) {
    %c0_i32 = arith.constant 0 : i32
    %c0_i32_0 = arith.constant 0 : i32
    %c0_i32_1 = arith.constant 0 : i32
    return %c0_i32, %c0_i32_0 : i32, i32
  }
  func.func @transform_2(%arg0: i32) -> (i32, i32) {
    %c0_i32 = arith.constant 0 : i32
    %c0_i32_0 = arith.constant 0 : i32
    %c0_i32_1 = arith.constant 0 : i32
    return %c0_i32, %c0_i32_0 : i32, i32
  }
  func.func @transform_3(%arg0: i32) -> (i32, i32, i32) {
    %c0_i32 = arith.constant 0 : i32
    %c0_i32_0 = arith.constant 0 : i32
    %c0_i32_1 = arith.constant 0 : i32
    %c0_i32_2 = arith.constant 0 : i32
    return %c0_i32, %c0_i32_0, %c0_i32_1 : i32, i32, i32
  }
  func.func @transform_4(%arg0: i32) -> (i32, i32) {
    %c0_i32 = arith.constant 0 : i32
    %c0_i32_0 = arith.constant 0 : i32
    %c0_i32_1 = arith.constant 0 : i32
    return %c0_i32, %c0_i32_0 : i32, i32
  }
  func.func @transform_5(%arg0: i32) -> (i32, i32) {
    %c0_i32 = arith.constant 0 : i32
    %c0_i32_0 = arith.constant 0 : i32
    return %arg0, %c0_i32 : i32, i32
  }
}

</mosaic_0001>

<bundles_post_ra>
// kernel: tpu_custom_call.1
= control target key start
LH: loop header
LB: loop body
LE: loop exit
PB: predicated region body
PF: predicated region fallthrough
CT: control target
= control target key end

     0   :  { %v1051_v5 = vmov 0.0   ;;  %v1052_v6 = vmov 0   ;;  %s1560_s0 = inlined_call_operand.vmem [shape: f32[16,256], index: 0, kind: input, shape index: {}]   ;;  %s1561_s1 = inlined_call_operand.vmem [shape: f32[8,16], index: 1, kind: input, shape index: {}]   ;;  %s1562_s2 = inlined_call_operand.vmem [shape: f32[8,1], index: 2, kind: input, shape index: {}]   ;;  %s1563_s3 = inlined_call_operand.vmem [shape: f32[4,16,8], index: 3, kind: input, shape index: {}]   ;;  %s1564_s4 = inlined_call_operand.vmem [shape: f32[16,1], index: 4, kind: input, shape index: {}]   ;;  %s1565_s5 = inlined_call_operand.hbm [shape: f32[16,256], index: 5, kind: output, shape index: {}]  }
   0x1   :  { %v200_v0 = vld [vmem:[%s1560_s0 + $0x8] sm:$0xff]  ;;  %v202_v1 = vld [vmem:[%s1560_s0 + $0x18] sm:$0xff]  ;;  %v199_v2 = vld [vmem:[%s1560_s0] sm:$0xff]  ;;  %278 = vmatprep.mubr.f32.mxu0 %v1051_v5  ;;  %1001 = vset.pattern.permute.xlu0 %v1052_v6 }
   0x2   :  { %v970_v3 = vpack.c.bf16 %v202_v1, %v200_v0  ;;  %v201_v4 = vld [vmem:[%s1560_s0 + $0x10] sm:$0xff]  ;;  %v204_v7 = vld [vmem:[%s1562_s2] sm:$0xff]  ;;  %704 = vmatprep.mubr.f32.mxu1 %v1051_v5 }
   0x3   :  { %v972_v8 = vpack.c.bf16 %v201_v4, %v199_v2  ;;  %207 = vperm.xlu0 %1001, %v204_v7  }
   0x4   :  { %10 = vsyncpa [#allocation3], 0  ;;  %971 = vmatprep.subr.bf16.mxu0 %v970_v3  ;;  %1002 = vset.pattern.permute.xlu1 %v1052_v6  ;;  %v203_v9 = vld [vmem:[%s1561_s1] sm:$0xff]  ;;  %vm210_vm0 = vcmask 130048   ;;  %v21_v10 = vlaneseq  ;;  %s1053_s0 = smov 127   ;;  %s1054_s2 = smov 2  }
   0x5   :  { %973 = vmatpush1.bf16.msra.mxu0 %v972_v8  ;;  %s1055_s1 = smov 126   ;;  %s1056_s30 = smov 1   ;;  %v1061_v54 = vmov -inf  }
   0x6   :  { %v1116_v11 = vand.u32 127, %v21_v10  ;;  %s1057_s6 = smov 16   ;;  %s1058_s7 = smov 112   ;;  %v43_v47 = vshrl.u32 %v21_v10, 7 }
   0x7   :  { %s1059_s8 = smov 32   ;;  %s1060_s9 = smov 96  }
   0x8   :  { %955 = vmatmul.mubr.msk.f32.vlgmr.msra.gmra.mrb[0].mxu0 %vm210_vm0, %v203_v9  ;;  %v24_v12 = vcvt.s32.f32 %v1116_v11  ;;  %v23_v15 = vadd.s32 128, %v1116_v11  ;;  %vm54_vm1 = vcmp.lt.s32.totalorder %v1116_v11, 127  ;;  %vm35_vm2 = vcmp.lt.s32.totalorder %v1116_v11, 1 }
   0x9   :  { %615 = vmatprep.mubr.f32.mxu0 %v1051_v5  ;;  %vm119_vm3 = vcmp.lt.s32.totalorder %v1116_v11, 2  ;;  %v1198_v52 = vsub.s32 0, %v43_v47  ;;  %vm138_vm8 = vcmp.lt.s32.totalorder %v1116_v11, 126  ;;  %vm73_vm13 = vcmp.lt.s32.totalorder %v1116_v11, 16 }
   0xa   :  { %v27_v13 = vmul.f32 0.0625, %v24_v12  ;;  %v25_v16 = vcvt.s32.f32 %v23_v15  ;;  %vm96_vm14 = vcmp.lt.s32.totalorder %v1116_v11, 112  ;;  %vm157_vm15 = vcmp.lt.s32.totalorder %v1116_v11, 32 }
   0xb   :  { %vm180_vm0 = vcmp.lt.s32.totalorder %v1116_v11, 96  ;;  %v967_v11 = vld [vmem:[%s1563_s3 + $0x38] sm:$0xff] }
   0xc   :  { %v1119_v14 = vfloor.f32 %v27_v13  ;;  %v28_v17 = vmul.f32 0.0625, %v25_v16 }
   0xe   :  { %50 = vrot.lane.b32.xlu1 %v1119_v14, %s1053_s0  ;;  %31 = vrot.lane.b32.xlu0 %v1119_v14, %s1056_s30  ;;  %v1130_v18 = vfloor.f32 %v28_v17 }
  0x12   :  { %115 = vrot.lane.b32.xlu1 %v1119_v14, %s1054_s2  ;;  %52 = vrot.lane.b32.xlu0 %v1130_v18, %s1053_s0 }
  0x16   :  { %134 = vrot.lane.b32.xlu1 %v1119_v14, %s1055_s1  ;;  %117 = vrot.lane.b32.xlu0 %v1130_v18, %s1054_s2 }
  0x1a   :  { %33 = vrot.lane.b32.xlu1 %v1130_v18, %s1056_s30  ;;  %136 = vrot.lane.b32.xlu0 %v1130_v18, %s1055_s1 }
  0x80   :  { %v51_v36 = vpop.permute.xlu1 %50 }
  0x82   :  { %v208_v19 = vpop.permute.xlu0 %207 }
  0x84   :  { %v116_v38 = vpop.permute.xlu1 %115 }
  0x86   :  { %v32_v37 = vpop.permute.xlu0 %31 }
  0x88   :  { %v135_v40 = vpop.permute.xlu1 %134 }
  0x8a   :  { %v53_v39 = vpop.permute.xlu0 %52 }
  0x8b   :  { %v55_v43 = vsel %vm54_vm1, %v51_v36, %v53_v39  ;;  %v56_v44 = vsel %vm54_vm1, %v53_v39, %v51_v36 }
  0x8c   :  { %v34_v42 = vpop.permute.xlu1 %33  ;;  %vm57_vm4 = vcmp.eq.f32.partialorder %v55_v43, %v1119_v14  ;;  %vm58_vm5 = vcmp.eq.f32.partialorder %v56_v44, %v1130_v18 }
  0x8d   :  { %v36_v45 = vsel %vm35_vm2, %v32_v37, %v34_v42  ;;  %v37_v46 = vsel %vm35_vm2, %v34_v42, %v32_v37  ;;  %v59_v55 = vsel %vm57_vm4, 0.0, %v1061_v54  ;;  %v60_v56 = vsel %vm58_vm5, 0.0, %v1061_v54 }
  0x8e   :  { %v118_v41 = vpop.permute.xlu0 %117  ;;  %vm38_vm6 = vcmp.eq.f32.partialorder %v37_v46, %v1119_v14  ;;  %vm39_vm7 = vcmp.eq.f32.partialorder %v36_v45, %v1130_v18  ;;  %v1216_v0 = vrot.slane %v59_v55, %v1198_v52  ;;  %v1219_v1 = vrot.slane %v60_v56, %v1198_v52 }
  0x8f   :  { %v120_v49 = vsel %vm119_vm3, %v116_v38, %v118_v41  ;;  %v121_v50 = vsel %vm119_vm3, %v118_v41, %v116_v38  ;;  %v40_v57 = vsel %vm38_vm6, 0.0, %v1061_v54  ;;  %v41_v58 = vsel %vm39_vm7, 0.0, %v1061_v54 }
  0x90   :  { %vm122_vm9 = vcmp.eq.f32.partialorder %v121_v50, %v1119_v14  ;;  %vm123_vm10 = vcmp.eq.f32.partialorder %v120_v49, %v1130_v18  ;;  %v1222_v2 = vrot.slane %v40_v57, %v1198_v52  ;;  %v1225_v3 = vrot.slane %v41_v58, %v1198_v52 }
  0x91   :  { %v124_v6 = vsel %vm122_vm9, 0.0, %v1061_v54  ;;  %v125_v7 = vsel %vm123_vm10, 0.0, %v1061_v54 }
  0x92   :  { %v137_v48 = vpop.permute.xlu0 %136  ;;  %v1238_v15 = vrot.slane %v124_v6, %v1198_v52  ;;  %v1241_v16 = vrot.slane %v125_v7, %v1198_v52 }
  0x93   :  { %v139_v59 = vsel %vm138_vm8, %v135_v40, %v137_v48  ;;  %v140_v60 = vsel %vm138_vm8, %v137_v48, %v135_v40 }
  0x94   :  { %vm141_vm11 = vcmp.eq.f32.partialorder %v139_v59, %v1119_v14  ;;  %vm142_vm12 = vcmp.eq.f32.partialorder %v140_v60, %v1130_v18 }
  0xdb   :  { %v280_v20 = vpop.f32.mrb[0].mxu0 }
  0xdc   :  { %v281_v21 = vadd.f32 %v280_v20, %v208_v19  ;;  %v282_v22 = vpop.f32.mrb[1].mxu0 }
  0xdd   :  { %v283_v23 = vadd.f32 %v282_v22, %v208_v19  ;;  %v144_v22 = vsel %vm142_vm12, 0.0, %v1061_v54 }
  0xde   :  { %v285_v24 = vsub.f32 0.0, %v281_v21 }
  0xdf   :  { %v286_v25 = vsub.f32 0.0, %v283_v23 }
  0xe0   :  { %v287_v26 = vmul.f32 1.442695, %v285_v24 }
  0xe1   :  { %v289_v27 = vmul.f32 1.442695, %v286_v25 }
  0xe2   :  { %1003 = vpow2.f32 %v287_v26 }
  0xe3   :  { %1005 = vpow2.f32 %v289_v27 }
  0xec   :  { %v1004_v28 = vpop.eup %1003 }
  0xed   :  { %v1006_v29 = vpop.eup %1005  ;;  %v291_v30 = vadd.f32 1.0, %v1004_v28 }
  0xee   :  { %v292_v31 = vadd.f32 1.0, %v1006_v29 }
  0xef   :  { %1007 = vrcp.f32 %v291_v30 }
  0xf0   :  { %1009 = vrcp.f32 %v292_v31  ;;  %v1259_v31 = vrot.slane %v144_v22, %v1198_v52 }
  0xf9   :  { %v1008_v32 = vpop.eup %1007 }
  0xfa   :  { %v1010_v33 = vpop.eup %1009  ;;  %v1140_v34 = vmul.f32 %v1008_v32, %v281_v21  ;;  %v143_v21 = vsel %vm141_vm11, 0.0, %v1061_v54 }
  0xfb   :  { %v1142_v35 = vmul.f32 %v1010_v33, %v283_v23  ;;  %v1256_v30 = vrot.slane %v143_v21, %v1198_v52 }
  0xfc   :  { %299 = vrot.lane.b32.xlu1 %v1140_v34, %s1056_s30 }
  0xfd   :  { %974 = vmatprep.subr.mxu1 %v1142_v35  ;;  %301 = vrot.lane.b32.xlu0 %v1142_v35, %s1056_s30 }
  0xfe   :  { %975 = vmatpush1.msra.mxu1 %v1140_v34 }
 0x100   :  { %309 = vrot.lane.b32.xlu1 %v1140_v34, %s1053_s0 }
 0x101   :  { %311 = vrot.lane.b32.xlu0 %v1142_v35, %s1053_s0 }
 0x104   :  { %319 = vrot.lane.b32.xlu1 %v1140_v34, %s1054_s2 }
 0x105   :  { %321 = vrot.lane.b32.xlu0 %v1142_v35, %s1054_s2 }
 0x108   :  { %329 = vrot.lane.b32.xlu1 %v1140_v34, %s1055_s1 }
 0x109   :  { %331 = vrot.lane.b32.xlu0 %v1142_v35, %s1055_s1 }
 0x10c   :  { %69 = vrot.lane.b32.xlu1 %v1119_v14, %s1057_s6 }
 0x10d   :  { %71 = vrot.lane.b32.xlu0 %v1130_v18, %s1057_s6 }
 0x110   :  { %92 = vrot.lane.b32.xlu1 %v1119_v14, %s1058_s7 }
 0x111   :  { %94 = vrot.lane.b32.xlu0 %v1130_v18, %s1058_s7 }
 0x114   :  { %153 = vrot.lane.b32.xlu1 %v1119_v14, %s1059_s8 }
 0x115   :  { %155 = vrot.lane.b32.xlu0 %v1130_v18, %s1059_s8 }
 0x118   :  { %176 = vrot.lane.b32.xlu1 %v1119_v14, %s1060_s9 }
 0x119   :  { %178 = vrot.lane.b32.xlu0 %v1130_v18, %s1060_s9 }
 0x16e   :  { %v300_v51 = vpop.permute.xlu1 %299 }
 0x16f   :  { %v302_v53 = vpop.permute.xlu0 %301 }
 0x170   :  { %v303_v61 = vsel %vm35_vm2, %v300_v51, %v302_v53  ;;  %v304_v62 = vsel %vm35_vm2, %v302_v53, %v300_v51 }
 0x171   :  { %v305_v10 = vadd.f32 %v304_v62, %v1222_v2  ;;  %v306_v12 = vadd.f32 %v303_v61, %v1225_v3 }
 0x172   :  { %v310_v63 = vpop.permute.xlu1 %309 }
 0x173   :  { %v312_v4 = vpop.permute.xlu0 %311  ;;  %v307_v25 = vmax.f32 %v1140_v34, %v305_v10  ;;  %v308_v26 = vmax.f32 %v1142_v35, %v306_v12 }
 0x174   :  { %v313_v8 = vsel %vm54_vm1, %v310_v63, %v312_v4  ;;  %v314_v9 = vsel %vm54_vm1, %v312_v4, %v310_v63 }
 0x175   :  { %v315_v17 = vadd.f32 %v313_v8, %v1216_v0  ;;  %v316_v19 = vadd.f32 %v314_v9, %v1219_v1 }
 0x176   :  { %v320_v13 = vpop.permute.xlu1 %319 }
 0x177   :  { %v322_v20 = vpop.permute.xlu0 %321  ;;  %v317_v32 = vmax.f32 %v307_v25, %v315_v17  ;;  %v318_v33 = vmax.f32 %v308_v26, %v316_v19 }
 0x178   :  { %v323_v23 = vsel %vm119_vm3, %v320_v13, %v322_v20  ;;  %v324_v24 = vsel %vm119_vm3, %v322_v20, %v320_v13 }
 0x179   :  { %v325_v27 = vadd.f32 %v324_v24, %v1238_v15  ;;  %v326_v28 = vadd.f32 %v323_v23, %v1241_v16 }
 0x17a   :  { %v330_v29 = vpop.permute.xlu1 %329 }
 0x17b   :  { %v332_v36 = vpop.permute.xlu0 %331  ;;  %v327_v39 = vmax.f32 %v317_v32, %v325_v27  ;;  %v328_v40 = vmax.f32 %v318_v33, %v326_v28 }
 0x17c   :  { %v333_v37 = vsel %vm138_vm8, %v330_v29, %v332_v36  ;;  %v334_v38 = vsel %vm138_vm8, %v332_v36, %v330_v29 }
 0x17d   :  { %v335_v41 = vadd.f32 %v333_v37, %v1256_v30  ;;  %v336_v42 = vadd.f32 %v334_v38, %v1259_v31 }
 0x17e   :  { %v70_v46 = vpop.permute.xlu1 %69 }
 0x17f   :  { %v1267_v43 = vmax.f32 %v327_v39, %v335_v41  ;;  %v1269_v44 = vmax.f32 %v328_v40, %v336_v42  ;;  %v72_v45 = vpop.permute.xlu0 %71 }
 0x180   :  { %v75_v49 = vsel %vm73_vm13, %v72_v45, %v70_v46  ;;  %v74_v50 = vsel %vm73_vm13, %v70_v46, %v72_v45 }
 0x181   :  { %341 = vrot.lane.b32.xlu0 %v1269_v44, %s1057_s6  ;;  %339 = vrot.lane.b32.xlu1 %v1267_v43, %s1057_s6  ;;  %v76_v57 = vsub.f32 %v75_v49, %v1119_v14  ;;  %v77_v58 = vsub.f32 %v74_v50, %v1130_v18 }
 0x182   :  { %v93_v48 = vpop.permute.xlu1 %92 }
 0x183   :  { %v95_v47 = vpop.permute.xlu0 %94  ;;  %v78_v63 = vand.u32 2147483647, %v76_v57  ;;  %v79_v7 = vand.u32 2147483647, %v77_v58 }
 0x184   :  { %v97_v51 = vsel %vm96_vm14, %v93_v48, %v95_v47  ;;  %v98_v53 = vsel %vm96_vm14, %v95_v47, %v93_v48 }
 0x185   :  { %351 = vrot.lane.b32.xlu0 %v1269_v44, %s1058_s7  ;;  %349 = vrot.lane.b32.xlu1 %v1267_v43, %s1058_s7  ;;  %v99_v59 = vsub.f32 %v97_v51, %v1119_v14  ;;  %v100_v60 = vsub.f32 %v98_v53, %v1130_v18  ;;  %vm80_vm4 = vcmp.eq.f32.partialorder %v78_v63, 1.0  ;;  %vm81_vm5 = vcmp.eq.f32.partialorder %v79_v7, 1.0 }
 0x186   :  { %v154_v56 = vpop.permute.xlu1 %153  ;;  %v82_v25 = vsel %vm80_vm4, 0.0, %v1061_v54  ;;  %v83_v26 = vsel %vm81_vm5, 0.0, %v1061_v54  ;;  %vm544_vm4 = vcmask 64512  }
 0x187   :  { %v156_v55 = vpop.permute.xlu0 %155  ;;  %v101_v8 = vand.u32 2147483647, %v99_v59  ;;  %v102_v9 = vand.u32 2147483647, %v100_v60  ;;  %v1327_v36 = vrot.slane %v83_v26, %v1198_v52 }
 0x188   :  { %v158_v61 = vsel %vm157_vm15, %v154_v56, %v156_v55  ;;  %v159_v62 = vsel %vm157_vm15, %v156_v55, %v154_v56 }
 0x189   :  { %361 = vrot.lane.b32.xlu0 %v1269_v44, %s1059_s8  ;;  %359 = vrot.lane.b32.xlu1 %v1267_v43, %s1059_s8  ;;  %v160_v10 = vsub.f32 %v159_v62, %v1119_v14  ;;  %v161_v12 = vsub.f32 %v158_v61, %v1130_v18  ;;  %vm103_vm6 = vcmp.eq.f32.partialorder %v101_v8, 1.0  ;;  %vm104_vm7 = vcmp.eq.f32.partialorder %v102_v9, 1.0 }
 0x18a   :  { %v177_v6 = vpop.permute.xlu1 %176  ;;  %v105_v27 = vsel %vm103_vm6, 0.0, %v1061_v54  ;;  %v106_v28 = vsel %vm104_vm7, 0.0, %v1061_v54 }
 0x18b   :  { %v179_v4 = vpop.permute.xlu0 %178  ;;  %v162_v19 = vand.u32 2147483647, %v160_v10  ;;  %v163_v20 = vand.u32 2147483647, %v161_v12  ;;  %v1330_v37 = vrot.slane %v105_v27, %v1198_v52  ;;  %v1333_v38 = vrot.slane %v106_v28, %v1198_v52 }
 0x18c   :  { %v181_v13 = vsel %vm180_vm0, %v177_v6, %v179_v4  ;;  %v182_v17 = vsel %vm180_vm0, %v179_v4, %v177_v6 }
 0x18d   :  { %371 = vrot.lane.b32.xlu0 %v1269_v44, %s1060_s9  ;;  %369 = vrot.lane.b32.xlu1 %v1267_v43, %s1060_s9  ;;  %v183_v21 = vsub.f32 %v181_v13, %v1119_v14  ;;  %v184_v22 = vsub.f32 %v182_v17, %v1130_v18  ;;  %vm164_vm9 = vcmp.eq.f32.partialorder %v162_v19, 2.0  ;;  %vm165_vm10 = vcmp.eq.f32.partialorder %v163_v20, 2.0 }
 0x18e   :  { %v1324_v18 = vrot.slane %v82_v25, %v1198_v52  ;;  %v166_v41 = vsel %vm164_vm9, 0.0, %v1061_v54  ;;  %v167_v42 = vsel %vm165_vm10, 0.0, %v1061_v54 }
 0x18f   :  { %v185_v29 = vand.u32 2147483647, %v183_v21  ;;  %v186_v32 = vand.u32 2147483647, %v184_v22  ;;  %v1344_v49 = vrot.slane %v166_v41, %v1198_v52  ;;  %v1347_v50 = vrot.slane %v167_v42, %v1198_v52 }
 0x191   :  { %vm187_vm11 = vcmp.eq.f32.partialorder %v185_v29, 2.0  ;;  %vm188_vm12 = vcmp.eq.f32.partialorder %v186_v32, 2.0 }
 0x192   :  { %v189_v57 = vsel %vm187_vm11, 0.0, %v1061_v54  ;;  %v190_v58 = vsel %vm188_vm12, 0.0, %v1061_v54 }
 0x193   :  { %v1362_v6 = vrot.slane %v189_v57, %v1198_v52  ;;  %v1365_v7 = vrot.slane %v190_v58, %v1198_v52  ;;  %v956_v52 = vld [vmem:[%s1563_s3 + $0x10] sm:$0xff] }
 0x1f3   :  { %v342_v23 = vpop.permute.xlu0 %341  ;;  %v340_v24 = vpop.permute.xlu1 %339 }
 0x1f4   :  { %v343_v33 = vsel %vm73_vm13, %v340_v24, %v342_v23  ;;  %v344_v14 = vsel %vm73_vm13, %v342_v23, %v340_v24 }
 0x1f5   :  { %v345_v47 = vadd.f32 %v344_v14, %v1324_v18  ;;  %v346_v48 = vadd.f32 %v343_v33, %v1327_v36 }
 0x1f7   :  { %v352_v39 = vpop.permute.xlu0 %351  ;;  %v350_v40 = vpop.permute.xlu1 %349  ;;  %v347_v61 = vmax.f32 %v1267_v43, %v345_v47  ;;  %v348_v62 = vmax.f32 %v1269_v44, %v346_v48 }
 0x1f8   :  { %v353_v45 = vsel %vm96_vm14, %v350_v40, %v352_v39  ;;  %v354_v46 = vsel %vm96_vm14, %v352_v39, %v350_v40 }
 0x1f9   :  { %v355_v51 = vadd.f32 %v353_v45, %v1330_v37  ;;  %v356_v53 = vadd.f32 %v354_v46, %v1333_v38 }
 0x1fb   :  { %v362_v55 = vpop.permute.xlu0 %361  ;;  %v360_v56 = vpop.permute.xlu1 %359  ;;  %v357_v54 = vmax.f32 %v347_v61, %v355_v51  ;;  %v358_v8 = vmax.f32 %v348_v62, %v356_v53 }
 0x1fc   :  { %v363_v59 = vsel %vm157_vm15, %v360_v56, %v362_v55  ;;  %v364_v60 = vsel %vm157_vm15, %v362_v55, %v360_v56 }
 0x1fd   :  { %v365_v63 = vadd.f32 %v364_v60, %v1344_v49  ;;  %v366_v4 = vadd.f32 %v363_v59, %v1347_v50 }
 0x1ff   :  { %v372_v9 = vpop.permute.xlu0 %371  ;;  %v370_v10 = vpop.permute.xlu1 %369  ;;  %v367_v44 = vmax.f32 %v357_v54, %v365_v63  ;;  %v368_v13 = vmax.f32 %v358_v8, %v366_v4  ;;  %v540_v4 = vld [vmem:[%s1563_s3 + $0x8] sm:$0xff] }
 0x200   :  { %v373_v12 = vsel %vm180_vm0, %v370_v10, %v372_v9  ;;  %v374_v43 = vsel %vm180_vm0, %v372_v9, %v370_v10  ;;  %961 = vmatmul.mubr.msk.f32.vlgmr.msra.gmra.mrb[0].mxu1 %vm544_vm4, %v540_v4 }
 0x201   :  { %v375_v17 = vadd.f32 %v373_v12, %v1362_v6  ;;  %v376_v19 = vadd.f32 %v374_v43, %v1365_v7  ;;  %784 = vmatprep.mubr.f32.mxu1 %v1051_v5 }
 0x203   :  { %v377_v20 = vmax.f32 %v367_v44, %v375_v17  ;;  %v378_v21 = vmax.f32 %v368_v13, %v376_v19 }
 0x205   :  { %381 = vrot.lane.b32.xlu0 %v378_v21, %s1056_s30  ;;  %551 = vmatprep.subr.mxu0 %v378_v21 }
 0x206   :  { %379 = vrot.lane.b32.xlu1 %v377_v20, %s1056_s30  ;;  %552 = vmatpush1.msra.mxu0 %v377_v20 }
 0x207   :  { %634 = vmatprep.subr.mxu0 %v1142_v35  ;;  %958 = vmatmul.mubr.msk.f32.vlgmr.msra.gmra.mrb[2].mxu0 %vm544_vm4, %v956_v52 }
 0x208   :  { %635 = vmatpush1.msra.mxu0 %v1140_v34  ;;  %621 = vmatprep.mubr.f32.mxu0 %v1051_v5 }
 0x209   :  { %391 = vrot.lane.b32.xlu0 %v378_v21, %s1053_s0 }
 0x20a   :  { %389 = vrot.lane.b32.xlu1 %v377_v20, %s1053_s0 }
 0x20d   :  { %401 = vrot.lane.b32.xlu0 %v378_v21, %s1054_s2 }
 0x20e   :  { %399 = vrot.lane.b32.xlu1 %v377_v20, %s1054_s2 }
 0x211   :  { %411 = vrot.lane.b32.xlu0 %v378_v21, %s1055_s1 }
 0x212   :  { %409 = vrot.lane.b32.xlu1 %v377_v20, %s1055_s1 }
 0x277   :  { %v382_v22 = vpop.permute.xlu0 %381 }
 0x278   :  { %v380_v35 = vpop.permute.xlu1 %379 }
 0x279   :  { %v383_v23 = vsel %vm35_vm2, %v380_v35, %v382_v22  ;;  %v384_v34 = vsel %vm35_vm2, %v382_v22, %v380_v35 }
 0x27a   :  { %v385_v28 = vadd.f32 %v384_v34, %v1222_v2  ;;  %v386_v29 = vadd.f32 %v383_v23, %v1225_v3 }
 0x27b   :  { %v392_v24 = vpop.permute.xlu0 %391 }
 0x27c   :  { %v390_v25 = vpop.permute.xlu1 %389  ;;  %v387_v42 = vmax.f32 %v377_v20, %v385_v28  ;;  %v388_v45 = vmax.f32 %v378_v21, %v386_v29 }
 0x27d   :  { %v393_v26 = vsel %vm54_vm1, %v390_v25, %v392_v24  ;;  %v394_v27 = vsel %vm54_vm1, %v392_v24, %v390_v25 }
 0x27e   :  { %v395_v33 = vadd.f32 %v393_v26, %v1216_v0  ;;  %v396_v14 = vadd.f32 %v394_v27, %v1219_v1 }
 0x27f   :  { %v402_v32 = vpop.permute.xlu0 %401 }
 0x280   :  { %v400_v39 = vpop.permute.xlu1 %399  ;;  %v397_v51 = vmax.f32 %v387_v42, %v395_v33  ;;  %v398_v53 = vmax.f32 %v388_v45, %v396_v14 }
 0x281   :  { %v403_v40 = vsel %vm119_vm3, %v400_v39, %v402_v32  ;;  %v404_v41 = vsel %vm119_vm3, %v402_v32, %v400_v39 }
 0x282   :  { %v405_v46 = vadd.f32 %v404_v41, %v1238_v15  ;;  %v406_v47 = vadd.f32 %v403_v40, %v1241_v16 }
 0x283   :  { %v412_v48 = vpop.permute.xlu0 %411 }
 0x284   :  { %v410_v55 = vpop.permute.xlu1 %409  ;;  %v407_v58 = vmax.f32 %v397_v51, %v405_v46  ;;  %v408_v59 = vmax.f32 %v398_v53, %v406_v47 }
 0x285   :  { %v413_v56 = vsel %vm138_vm8, %v410_v55, %v412_v48  ;;  %v414_v57 = vsel %vm138_vm8, %v412_v48, %v410_v55 }
 0x286   :  { %v415_v60 = vadd.f32 %v413_v56, %v1256_v30  ;;  %v416_v61 = vadd.f32 %v414_v57, %v1259_v31 }
 0x288   :  { %v417_v62 = vmax.f32 %v407_v58, %v415_v60  ;;  %v418_v63 = vmax.f32 %v408_v59, %v416_v61 }
 0x28a   :  { %421 = vrot.lane.b32.xlu0 %v418_v63, %s1057_s6  ;;  %419 = vrot.lane.b32.xlu1 %v417_v62, %s1057_s6 }
 0x28e   :  { %431 = vrot.lane.b32.xlu0 %v418_v63, %s1058_s7  ;;  %429 = vrot.lane.b32.xlu1 %v417_v62, %s1058_s7 }
 0x292   :  { %441 = vrot.lane.b32.xlu0 %v418_v63, %s1059_s8  ;;  %439 = vrot.lane.b32.xlu1 %v417_v62, %s1059_s8 }
 0x296   :  { %451 = vrot.lane.b32.xlu0 %v418_v63, %s1060_s9  ;;  %449 = vrot.lane.b32.xlu1 %v417_v62, %s1060_s9 }
 0x2fc   :  { %v422_v54 = vpop.permute.xlu0 %421  ;;  %v420_v8 = vpop.permute.xlu1 %419 }
 0x2fd   :  { %v423_v9 = vsel %vm73_vm13, %v420_v8, %v422_v54  ;;  %v424_v10 = vsel %vm73_vm13, %v422_v54, %v420_v8 }
 0x2fe   :  { %v425_v17 = vadd.f32 %v424_v10, %v1324_v18  ;;  %v426_v19 = vadd.f32 %v423_v9, %v1327_v36 }
 0x300   :  { %v432_v12 = vpop.permute.xlu0 %431  ;;  %v430_v43 = vpop.permute.xlu1 %429  ;;  %v427_v34 = vmax.f32 %v417_v62, %v425_v17  ;;  %v428_v24 = vmax.f32 %v418_v63, %v426_v19 }
 0x301   :  { %v433_v44 = vsel %vm96_vm14, %v430_v43, %v432_v12  ;;  %v434_v13 = vsel %vm96_vm14, %v432_v12, %v430_v43 }
 0x302   :  { %v435_v20 = vadd.f32 %v433_v44, %v1330_v37  ;;  %v436_v21 = vadd.f32 %v434_v13, %v1333_v38 }
 0x304   :  { %v442_v52 = vpop.permute.xlu0 %441  ;;  %v440_v22 = vpop.permute.xlu1 %439  ;;  %v437_v27 = vmax.f32 %v427_v34, %v435_v20  ;;  %v438_v28 = vmax.f32 %v428_v24, %v436_v21 }
 0x305   :  { %v443_v35 = vsel %vm157_vm15, %v440_v22, %v442_v52  ;;  %v444_v23 = vsel %vm157_vm15, %v442_v52, %v440_v22 }
 0x306   :  { %v445_v25 = vadd.f32 %v444_v23, %v1344_v49  ;;  %v446_v26 = vadd.f32 %v443_v35, %v1347_v50  ;;  %v892_v35 = vld [vmem:[%s1564_s4 + $0x8] sm:$0xff]  ;;  %v891_v23 = vld [vmem:[%s1564_s4] sm:$0xff] }
 0x308   :  { %v452_v29 = vpop.permute.xlu0 %451  ;;  %v450_v32 = vpop.permute.xlu1 %449  ;;  %v447_v39 = vmax.f32 %v437_v27, %v445_v25  ;;  %v448_v40 = vmax.f32 %v438_v28, %v446_v26 }
 0x309   :  { %v453_v33 = vsel %vm180_vm0, %v450_v32, %v452_v29  ;;  %v454_v14 = vsel %vm180_vm0, %v452_v29, %v450_v32 }
 0x30a   :  { %v455_v41 = vadd.f32 %v453_v33, %v1362_v6  ;;  %v456_v42 = vadd.f32 %v454_v14, %v1365_v7 }
 0x30c   :  { %v457_v45 = vmax.f32 %v447_v39, %v455_v41  ;;  %v458_v46 = vmax.f32 %v448_v40, %v456_v42 }
 0x30e   :  { %461 = vrot.lane.b32.xlu0 %v458_v46, %s1056_s30  ;;  %720 = vmatprep.subr.mxu1 %v458_v46 }
 0x30f   :  { %459 = vrot.lane.b32.xlu1 %v457_v45, %s1056_s30  ;;  %721 = vmatpush1.msra.mxu1 %v457_v45 }
 0x312   :  { %471 = vrot.lane.b32.xlu0 %v458_v46, %s1053_s0 }
 0x313   :  { %469 = vrot.lane.b32.xlu1 %v457_v45, %s1053_s0 }
 0x316   :  { %481 = vrot.lane.b32.xlu0 %v458_v46, %s1054_s2 }
 0x317   :  { %479 = vrot.lane.b32.xlu1 %v457_v45, %s1054_s2 }
 0x31a   :  { %491 = vrot.lane.b32.xlu0 %v458_v46, %s1055_s1 }
 0x31b   :  { %489 = vrot.lane.b32.xlu1 %v457_v45, %s1055_s1 }
 0x380   :  { %v462_v47 = vpop.permute.xlu0 %461 }
 0x381   :  { %v460_v48 = vpop.permute.xlu1 %459 }
 0x382   :  { %v463_v51 = vsel %vm35_vm2, %v460_v48, %v462_v47  ;;  %v464_v53 = vsel %vm35_vm2, %v462_v47, %v460_v48 }
 0x383   :  { %v465_v59 = vadd.f32 %v464_v53, %v1222_v2  ;;  %v466_v60 = vadd.f32 %v463_v51, %v1225_v3 }
 0x384   :  { %v472_v55 = vpop.permute.xlu0 %471 }
 0x385   :  { %v470_v56 = vpop.permute.xlu1 %469  ;;  %v467_v9 = vmax.f32 %v457_v45, %v465_v59  ;;  %v468_v10 = vmax.f32 %v458_v46, %v466_v60 }
 0x386   :  { %v473_v57 = vsel %vm54_vm1, %v470_v56, %v472_v55  ;;  %v474_v58 = vsel %vm54_vm1, %v472_v55, %v470_v56 }
 0x387   :  { %v475_v62 = vadd.f32 %v473_v57, %v1216_v0  ;;  %v476_v63 = vadd.f32 %v474_v58, %v1219_v1 }
 0x388   :  { %v482_v61 = vpop.permute.xlu0 %481 }
 0x389   :  { %v480_v4 = vpop.permute.xlu1 %479  ;;  %v477_v3 = vmax.f32 %v467_v9, %v475_v62  ;;  %v478_v44 = vmax.f32 %v468_v10, %v476_v63 }
 0x38a   :  { %v483_v54 = vsel %vm119_vm3, %v480_v4, %v482_v61  ;;  %v484_v8 = vsel %vm119_vm3, %v482_v61, %v480_v4 }
 0x38b   :  { %v485_v12 = vadd.f32 %v484_v8, %v1238_v15  ;;  %v486_v2 = vadd.f32 %v483_v54, %v1241_v16  ;;  %v957_v15 = vld [vmem:[%s1563_s3 + $0x18] sm:$0xff]  ;;  %v962_v16 = vld [vmem:[%s1563_s3 + $0x20] sm:$0xff] }
 0x38c   :  { %v492_v43 = vpop.permute.xlu0 %491  ;;  %959 = vmatmul.mubr.msk.f32.gmra.mrb[4].mxu0 %vm544_vm4, %v957_v15  ;;  %964 = vmatmul.mubr.msk.f32.vlgmr.msra.gmra.mrb[2].mxu1 %vm544_vm4, %v962_v16 }
 0x38d   :  { %v490_v13 = vpop.permute.xlu1 %489  ;;  %v487_v17 = vmax.f32 %v477_v3, %v485_v12  ;;  %v488_v19 = vmax.f32 %v478_v44, %v486_v2  ;;  %698 = vmatprep.mubr.f32.mxu0 %v1051_v5  ;;  %790 = vmatprep.mubr.f32.mxu1 %v1051_v5 }
 0x38e   :  { %v493_v0 = vsel %vm138_vm8, %v490_v13, %v492_v43  ;;  %v494_v1 = vsel %vm138_vm8, %v492_v43, %v490_v13 }
 0x38f   :  { %v495_v20 = vadd.f32 %v493_v0, %v1256_v30  ;;  %v496_v21 = vadd.f32 %v494_v1, %v1259_v31  ;;  %v539_v30 = vld [vmem:[%s1563_s3] sm:$0xff]  ;;  %v963_v31 = vld [vmem:[%s1563_s3 + $0x28] sm:$0xff] }
 0x390   :  { %960 = vmatmul.mubr.msk.f32.vlgmr.msra.gmra.mrb[2].mxu0 %vm544_vm4, %v539_v30  ;;  %965 = vmatmul.mubr.msk.f32.gmra.mrb[0].mxu1 %vm544_vm4, %v963_v31 }
 0x391   :  { %v497_v52 = vmax.f32 %v487_v17, %v495_v20  ;;  %v498_v22 = vmax.f32 %v488_v19, %v496_v21  ;;  %874 = vmatprep.mubr.f32.mxu1 %v1051_v5 }
 0x393   :  { %501 = vrot.lane.b32.xlu0 %v498_v22, %s1057_s6  ;;  %499 = vrot.lane.b32.xlu1 %v497_v52, %s1057_s6 }
 0x397   :  { %511 = vrot.lane.b32.xlu0 %v498_v22, %s1058_s7  ;;  %509 = vrot.lane.b32.xlu1 %v497_v52, %s1058_s7 }
 0x39b   :  { %521 = vrot.lane.b32.xlu0 %v498_v22, %s1059_s8  ;;  %519 = vrot.lane.b32.xlu1 %v497_v52, %s1059_s8 }
 0x39f   :  { %531 = vrot.lane.b32.xlu0 %v498_v22, %s1060_s9  ;;  %529 = vrot.lane.b32.xlu1 %v497_v52, %s1060_s9 }
 0x3a3   :  { %900 = vperm.xlu0 %1001, %v892_v35   ;;  %895 = vperm.xlu1 %1002, %v891_v23  }
 0x405   :  { %v502_v34 = vpop.permute.xlu0 %501  ;;  %v500_v24 = vpop.permute.xlu1 %499 }
 0x406   :  { %v503_v25 = vsel %vm73_vm13, %v500_v24, %v502_v34  ;;  %v504_v26 = vsel %vm73_vm13, %v502_v34, %v500_v24 }
 0x407   :  { %v505_v33 = vadd.f32 %v504_v26, %v1324_v18  ;;  %v506_v14 = vadd.f32 %v503_v25, %v1327_v36 }
 0x409   :  { %v512_v27 = vpop.permute.xlu0 %511  ;;  %v510_v28 = vpop.permute.xlu1 %509  ;;  %v507_v47 = vmax.f32 %v497_v52, %v505_v33  ;;  %v508_v48 = vmax.f32 %v498_v22, %v506_v14 }
 0x40a   :  { %v513_v29 = vsel %vm96_vm14, %v510_v28, %v512_v27  ;;  %v514_v32 = vsel %vm96_vm14, %v512_v27, %v510_v28 }
 0x40b   :  { %v515_v39 = vadd.f32 %v513_v29, %v1330_v37  ;;  %v516_v40 = vadd.f32 %v514_v32, %v1333_v38 }
 0x40d   :  { %v522_v41 = vpop.permute.xlu0 %521  ;;  %v520_v42 = vpop.permute.xlu1 %519  ;;  %v517_v53 = vmax.f32 %v507_v47, %v515_v39  ;;  %v518_v36 = vmax.f32 %v508_v48, %v516_v40 }
 0x40e   :  { %v523_v45 = vsel %vm157_vm15, %v520_v42, %v522_v41  ;;  %v524_v46 = vsel %vm157_vm15, %v522_v41, %v520_v42 }
 0x40f   :  { %v525_v51 = vadd.f32 %v524_v46, %v1344_v49  ;;  %v526_v18 = vadd.f32 %v523_v45, %v1347_v50  ;;  %v966_v50 = vld [vmem:[%s1563_s3 + $0x30] sm:$0xff]  ;;  %s1062_s3 = smov [#allocation2]  }
 0x410   :  { %s944_s29 = sshll.u32 %s1062_s3, 4  ;;  %s945_s29 = int_to_ptr.vmem [resolvable:$true] %s944_s29 }
 0x411   :  { %v532_v55 = vpop.permute.xlu0 %531  ;;  %v530_v37 = vpop.permute.xlu1 %529  ;;  %v527_v57 = vmax.f32 %v517_v53, %v525_v51  ;;  %v528_v58 = vmax.f32 %v518_v36, %v526_v18  ;;  %s1027_s0 = scalar_lea.vmem %s945_s29, 512  ;;  %p1032_p1 = scmp.lt.s32.totalorder %s945_s29, %s945_s29 }
 0x412   :  { %v533_v38 = vsel %vm180_vm0, %v530_v37, %v532_v55  ;;  %v534_v56 = vsel %vm180_vm0, %v532_v55, %v530_v37  ;;  %p1028_p0 = scmp.ne.s32.totalorder %s945_s29, %s1027_s0  ;;  %p1033_p2 = scmp.lt.s32.totalorder %s1027_s0, %s1027_s0 }
 0x413   :  { %v535_v59 = vadd.f32 %v533_v38, %v1362_v6  ;;  %v536_v60 = vadd.f32 %v534_v56, %v1365_v7 }
 0x414   :  { %p1034_p3 = por %p1033_p2, %p1032_p1 }
 0x415   :  { %v537_v61 = vmax.f32 %v527_v57, %v535_v59  ;;  %v538_v49 = vmax.f32 %v528_v58, %v536_v60 }
 0x416   :  { %p1035_p4 = pnand %p1034_p3, %p1028_p0 }
 0x417   :  { %810 = vmatprep.subr.mxu1 %v538_v49 }
 0x418   :  { %811 = vmatpush1.msra.mxu1 %v537_v61 }
 0x419   :  { %968 = vmatmul.mubr.msk.f32.vlgmr.msra.gmra.mrb[2].mxu1 %vm544_vm4, %v966_v50 }
 0x41a   :  { %880 = vmatprep.mubr.f32.mxu1 %v1051_v5 }
 0x41d   :  { %969 = vmatmul.mubr.msk.f32.gmra.mrb[0].mxu1 %vm544_vm4, %v967_v11 }
 0x422   :  { %v896_v54 = vpop.permute.xlu1 %895  ;;  %v901_v13 = vpop.permute.xlu0 %900 }
 0x45f   :  { %v623_v6 = vpop.f32.mrb[4].mxu0 }
 0x460   :  { %v625_v7 = vpop.f32.mrb[5].mxu0 }
 0x463   :  { %v700_v62 = vpop.f32.mrb[2].mxu0 }
 0x464   :  { %v702_v63 = vpop.f32.mrb[3].mxu0 }
 0x4ec   :  { %v876_v4 = vpop.f32.mrb[2].mxu1 }
 0x4ed   :  { %v976_v8 = vadd.f32 %v876_v4, %v700_v62  ;;  %v878_v9 = vpop.f32.mrb[3].mxu1 }
 0x4ee   :  { %v977_v10 = vadd.f32 %v878_v9, %v702_v63 }
 0x4ef   :  { %v903_v12 = vadd.f32 %v976_v8, %v896_v54 }
 0x4f0   :  { %v904_v2 = vadd.f32 %v977_v10, %v896_v54  ;;  %v882_v43 = vpop.f32.mrb[0].mxu1 }
 0x4f1   :  { %v907_v3 = vsub.f32 0.0, %v903_v12  ;;  %v978_v5 = vadd.f32 %v882_v43, %v623_v6  ;;  %v884_v44 = vpop.f32.mrb[1].mxu1 }
 0x4f2   :  { %v908_v0 = vsub.f32 0.0, %v904_v2  ;;  %v979_v1 = vadd.f32 %v884_v44, %v625_v7 }
 0x4f3   :  { %v911_v17 = vmul.f32 1.442695, %v907_v3  ;;  %v905_v19 = vadd.f32 %v978_v5, %v901_v13 }
 0x4f4   :  { %v913_v20 = vmul.f32 1.442695, %v908_v0  ;;  %v906_v21 = vadd.f32 %v979_v1, %v901_v13 }
 0x4f5   :  { %1011 = vpow2.f32 %v911_v17  ;;  %v909_v15 = vsub.f32 0.0, %v905_v19 }
 0x4f6   :  { %1013 = vpow2.f32 %v913_v20  ;;  %v910_v16 = vsub.f32 0.0, %v906_v21 }
 0x4f7   :  { %v915_v52 = vmul.f32 1.442695, %v909_v15 }
 0x4f8   :  { %v917_v22 = vmul.f32 1.442695, %v910_v16 }
 0x4f9   :  { %1015 = vpow2.f32 %v915_v52 }
 0x4fa   :  { %1017 = vpow2.f32 %v917_v22 }
 0x4ff   :  { %v1012_v30 = vpop.eup %1011 }
 0x500   :  { %v1014_v31 = vpop.eup %1013  ;;  %v919_v35 = vadd.f32 1.0, %v1012_v30 }
 0x501   :  { %v920_v23 = vadd.f32 1.0, %v1014_v31 }
 0x502   :  { %1019 = vrcp.f32 %v919_v35 }
 0x503   :  { %v1016_v34 = vpop.eup %1015  ;;  %1021 = vrcp.f32 %v920_v23 }
 0x504   :  { %v1018_v24 = vpop.eup %1017  ;;  %v921_v25 = vadd.f32 1.0, %v1016_v34 }
 0x505   :  { %v922_v26 = vadd.f32 1.0, %v1018_v24 }
 0x506   :  { %1023 = vrcp.f32 %v921_v25 }
 0x507   :  { %1025 = vrcp.f32 %v922_v26 }
 0x50c   :  { %v1020_v27 = vpop.eup %1019 }
 0x50d   :  { %v1022_v28 = vpop.eup %1021  ;;  %v931_v29 = vmul.f32 %v1020_v27, %v903_v12 }
 0x50e   :  { %v932_v32 = vmul.f32 %v1022_v28, %v904_v2 }
 0x50f   :  { %935 = vst [vmem:[#allocation2] sm:$0xff] %v931_v29 }
 0x510   :  { %v1024_v33 = vpop.eup %1023  ;;  %936 = vst [vmem:[#allocation2 + $0x8] sm:$0xff] %v932_v32 }
 0x511   :  { %v1026_v14 = vpop.eup %1025  ;;  %v933_v39 = vmul.f32 %v1024_v33, %v905_v19 }
 0x512   :  { %v934_v40 = vmul.f32 %v1026_v14, %v906_v21 }
 0x513   :  { %937 = vst [vmem:[#allocation2 + $0x10] sm:$0xff] %v933_v39 }
 0x514   :  { %938 = vst [vmem:[#allocation2 + $0x18] sm:$0xff] %v934_v40 }
 0x515   :  { %1038 = shalt.err (!%p1035_p4)
}
 0x516   :  { %s1039_s30 = scalar_lea.hbm %s1565_s5, 512 }
 0x517   :  { %p1040_p5 = scmp.ne.s32.totalorder %s1565_s5, %s1039_s30  ;;  %p1043_p6 = scmp.lt.u32.totalorder %s1039_s30, %s1565_s5 }
 0x519   :  { %p1045_p7 = pnand %p1043_p6, %p1040_p5 }
 0x51b   :  { %1048 = shalt.err (!%p1045_p7)
}
 0x51c   :  { %s1063_s11 = smov 256  }
 0x51d   :  { %950 = dma.vmem_to_hbm [thread:$0]  %s945_s29, 512, %s1565_s5, [#allocation3], %s1063_s11, %s1063_s11, %s1057_s6  }
 0x51e   :  { %1049 = dma.done.wait [#allocation3], 512  }
 0x51f   :  { %1050 = vsyncadd [#allocation3], 4294966784 }
 0x520   :  { %954 = vsyncpa [#allocation3], 1 }

</bundles_post_ra>
